<compile_context>
chip_gen: v6e
topology: v6e:2x2x1
jax: 0.10.0
libtpu: 0.0.40
codegen_flags: <defaults>
</compile_context>

<pallas_src>
import jax
import jax.numpy as jnp
from jax import lax
from jax.experimental import pallas as pl
from jax.experimental.pallas import tpu as pltpu


def _round_up(x, m):
    return ((x + m - 1) // m) * m


def _lstm_head_kernel(x_ref, wih_ref, whh_ref, b_ref, wefft_ref, befft_ref,
                      out_ref,
                      h_sc, c_sc, gx_sc, hall_sc):
    """One sequence tile of LSTM + fused (Linear∘Linear) + softmax.

    Layout (time rows on sublanes for the recurrence, time on lanes for the
    epilogue so the output is lane-dense):
      x_ref     : (T, F)    sequence tile
      wih_ref   : (F, 4H)   input->gate weights  (g-gate columns pre-scaled x2)
      whh_ref   : (H, 4H)   hidden->gate weights (g-gate columns pre-scaled x2)
      b_ref     : (1, 4H)   b_ih + b_hh          (g block pre-scaled x2)
      wefft_ref : (C, H)    fused head weight, transposed  (w0^T @ w1^T)^T
      befft_ref : (C, 1)    fused head bias, transposed
      out_ref   : (C, T)    softmax over the C (sublane) axis  -- lane-dense
      h_sc,c_sc : (1, H)    LSTM state carried across grid (seq tile) steps
      gx_sc     : (T, 4H)   per-tile input contribution to all gates
      hall_sc   : (T, H)    per-tile hidden states
    """
    tile = x_ref.shape[0]
    H = whh_ref.shape[0]
    n_chunks = tile // 8

    # Zero the carried LSTM state on the first sequence tile only.
    @pl.when(pl.program_id(0) == 0)
    def _():
        h_sc[...] = jnp.zeros_like(h_sc)
        c_sc[...] = jnp.zeros_like(c_sc)

    # Input contribution to all 4 gates for every timestep of this tile:
    # one MXU pass (T, F) @ (F, 4H), f32 accumulation.
    gx_sc[...] = (
        jnp.dot(x_ref[...], wih_ref[...], preferred_element_type=jnp.float32)
        + b_ref[...]
    )

    # Whole-vreg constants that turn sigmoid(2z) on the g block into tanh(z)
    # (2*s - 1 on the g lanes, identity elsewhere).  Hoisted out of all loops.
    lane = lax.broadcasted_iota(jnp.int32, (1, 4 * H), 1)
    is_g = (lane >= 2 * H) & (lane < 3 * H)
    gate_mul = jnp.where(is_g, 2.0, 1.0).astype(jnp.float32)
    gate_add = jnp.where(is_g, -1.0, 0.0).astype(jnp.float32)

    # For small H the recurrence runs on the VPU with W_hh^T pinned in vregs
    # (1 vreg at H=2).  For larger H that hoist would spill, so use the MXU.
    small_h = H <= 8
    if small_h:
        whh = whh_ref[...].astype(jnp.float32)        # (H, 4H)

    def step(idx, h, c):
        # Direct per-row load from VMEM (vld slot) -- no sublane extraction
        # on the serial chain.
        gx_row = gx_sc[pl.ds(idx, 1), :]              # (1, 4H)
        if small_h:
            # h @ W_hh^T == sum_k h[:, k] * whh[k, :]  (VPU broadcast FMAs)
            rec = h[:, 0:1] * whh[0:1, :]
            for k in range(1, H):
                rec = rec + h[:, k:k + 1] * whh[k:k + 1, :]
        else:
            rec = jnp.dot(h, whh_ref[...], preferred_element_type=jnp.float32)
        g = gx_row + rec                              # (1, 4H)
        # Single EUP launch over all 4H gate lanes; whole-vreg fixup converts
        # the (pre-scaled) g block to tanh before the per-gate extractions.
        s = jax.nn.sigmoid(g) * gate_mul + gate_add
        i_g = s[:, 0 * H:1 * H]
        f_g = s[:, 1 * H:2 * H]
        g_g = s[:, 2 * H:3 * H]
        o_g = s[:, 3 * H:4 * H]
        c = f_g * c + i_g * g_g
        h = o_g * jnp.tanh(c)
        # Off-chain store of the hidden row (idle vst slot).
        hall_sc[pl.ds(idx, 1), :] = h
        return h, c

    def chunk_body(ci, carry):
        h, c = carry
        base = pl.multiple_of(ci * 8, 8)
        for t in range(8):                            # unrolled: LLO sees chain
            h, c = step(base + t, h, c)
        return (h, c)

    hN, cN = lax.fori_loop(0, n_chunks, chunk_body, (h_sc[...], c_sc[...]))
    h_sc[...] = hN
    c_sc[...] = cN

    # dropout(p=0.2) is identity in eval mode.
    # Lane-dense transposed head: z (C, T) = W_eff^T @ hall^T + B_eff^T,
    # expressed as the A @ B^T dot_general pattern (contract on dim 1 of both)
    # so no explicit big transpose is materialized.  Softmax over the class
    # (sublane) axis with exact normalization; output store is lane-dense.
    z = lax.dot_general(
        wefft_ref[...], hall_sc[...],
        dimension_numbers=(((1,), (1,)), ((), ())),
        preferred_element_type=jnp.float32,
    ) + befft_ref[...]                                # (C, T)
    z = z - jnp.max(z, axis=0, keepdims=True)
    e = jnp.exp(z)
    out_ref[...] = e / jnp.sum(e, axis=0, keepdims=True)


def _vmem_estimate_bytes(tile, feat, H, C):
    """Lane-padding-aware VMEM estimate (every array pads to (8,128) tiles)."""
    pad = lambda r, c: _round_up(max(r, 1), 8) * _round_up(max(c, 1), 128) * 4
    est = (2 * pad(tile, feat)                    # x tile, double-buffered
           + pad(tile, 4 * H)                     # gx scratch
           + pad(tile, H)                         # hall scratch
           + 2 * pad(C, tile)                     # out tile, double-buffered
           + 2 * (pad(feat, 4 * H) + pad(H, 4 * H) + pad(1, 4 * H)
                  + pad(C, H) + pad(C, 1)))       # weights
    return est + (2 << 20)                        # slack


def occupancy_baseline_forward(x, params, *, seq_tile=1024, use_bf16_matmul=False):
    """x: (1, seq, feat) float32.  Returns (seq, classes) float32."""
    assert x.shape[0] == 1, "forward assumes batch=1 (matches .squeeze(0))"
    x2d = x[0].astype(jnp.float32)                # (seq, feat)
    seq, feat = x2d.shape

    w_ih, w_hh, b_ih, b_hh = (params["w_ih"], params["w_hh"],
                              params["b_ih"], params["b_hh"])
    w0, b0, w1, b1 = params["w0"], params["b0"], params["w1"], params["b1"]
    H = w_hh.shape[1]
    C = w1.shape[0]

    # Gate order is (i|f|g|o).  Pre-scale the g-gate columns by 2 so the kernel
    # can use one sigmoid over all 4H lanes and recover tanh as 2*sigmoid(2z)-1.
    gate_scale = jnp.concatenate([
        jnp.ones((2 * H,), jnp.float32),
        jnp.full((H,), 2.0, jnp.float32),
        jnp.ones((H,), jnp.float32),
    ])[None, :]                                        # (1, 4H)
    wih_t = w_ih.T.astype(jnp.float32) * gate_scale    # (feat, 4H)
    whh_t = w_hh.T.astype(jnp.float32) * gate_scale    # (H, 4H)
    bias = (b_ih + b_hh).astype(jnp.float32)[None, :] * gate_scale  # (1, 4H)

    # Fuse Linear(H->1) and Linear(1->C): both linear, so exact.  Kernel uses
    # the transposed forms for a lane-dense (C, T) epilogue.
    w1_t = w1.T.astype(jnp.float32)                    # (1, C)
    w_eff = w0.T.astype(jnp.float32) @ w1_t            # (H, C)
    b_eff = b0.astype(jnp.float32)[None, :] @ w1_t + b1.astype(jnp.float32)[None, :]
    wefft = w_eff.T                                    # (C, H)
    befft = b_eff.T                                    # (C, 1)

    if use_bf16_matmul:
        # The MXU is bf16-native on all generations (v5e/v6e/v7x); this only
        # affects the gx matmul operands (f32 accumulation).  The recurrence,
        # gate math and W_hh stay in f32 (required on v5e VPU/EUP, and keeps
        # the x2 pre-scaled g columns at full precision).
        x2d = x2d.astype(jnp.bfloat16)
        wih_t = wih_t.astype(jnp.bfloat16)

    # Choose the sequence tile.  Pad the sequence (zeros) to a multiple of the
    # tile; the LSTM is causal, so trailing padding never affects outputs 0..seq.
    seq8 = _round_up(max(seq, 1), 8)
    if seq8 <= seq_tile:
        tile = seq8                       # single tile: block dims == full dims
    else:
        tile = max(128, _round_up(seq_tile, 128))   # lane-legal (C, tile) out
    seq_pad = _round_up(seq, tile)
    if seq_pad != seq:
        x2d = jnp.pad(x2d, ((0, seq_pad - seq), (0, 0)))
    n_tiles = seq_pad // tile

    # Only raise the scoped-VMEM limit if the requested tile actually needs it
    # (default tile=1024 is ~2.2 MiB, fine under every generation's default).
    est = _vmem_estimate_bytes(tile, feat, H, C)
    vmem_limit = None
    if est > 12 * 1024 * 1024:
        vmem_limit = int(min(est, 64 * 1024 * 1024))

    const = lambda i: (0, 0)
    out = pl.pallas_call(
        _lstm_head_kernel,
        out_shape=jax.ShapeDtypeStruct((C, seq_pad), jnp.float32),
        grid_spec=pltpu.PrefetchScalarGridSpec(
            num_scalar_prefetch=0,
            grid=(n_tiles,),
            in_specs=[
                pl.BlockSpec((tile, feat), lambda i: (i, 0)),   # x tile
                pl.BlockSpec((feat, 4 * H), const),             # W_ih^T
                pl.BlockSpec((H, 4 * H), const),                # W_hh^T
                pl.BlockSpec((1, 4 * H), const),                # bias
                pl.BlockSpec((C, H), const),                    # W_eff^T
                pl.BlockSpec((C, 1), const),                    # B_eff^T
            ],
            out_specs=pl.BlockSpec((C, tile), lambda i: (0, i)),  # lane-dense
            scratch_shapes=[
                pltpu.VMEM((1, H), jnp.float32),         # h carry
                pltpu.VMEM((1, H), jnp.float32),         # c carry
                pltpu.VMEM((tile, 4 * H), jnp.float32),  # gx (per tile)
                pltpu.VMEM((tile, H), jnp.float32),      # hidden states
            ],
        ),
        compiler_params=pltpu.CompilerParams(
            # The recurrence is carried across seq tiles -> sequential grid.
            # TODO(synk): if batch>1 sequences are ever needed, add a leading
            # "parallel" batch axis so v7x's second TensorCore is used.
            dimension_semantics=("arbitrary",),
            vmem_limit_bytes=vmem_limit,
        ),
    )(x2d, wih_t, whh_t, bias, wefft, befft)

    # (C, seq_pad) -> (seq, C); the wrapper transpose is a tiny XLA op.
    return out[:, :seq].T


def _reference_forward(x, params):
    """Pure-JAX reference (mirrors torch.nn.LSTM + heads), for verification."""
    x2d = x[0]
    w_ih, w_hh = params["w_ih"], params["w_hh"]
    b = params["b_ih"] + params["b_hh"]
    H = w_hh.shape[1]

    def step(carry, xt):
        h, c = carry
        g = xt @ w_ih.T + h @ w_hh.T + b
        i = jax.nn.sigmoid(g[0 * H:1 * H])
        f = jax.nn.sigmoid(g[1 * H:2 * H])
        gg = jnp.tanh(g[2 * H:3 * H])
        o = jax.nn.sigmoid(g[3 * H:4 * H])
        c = f * c + i * gg
        h = o * jnp.tanh(c)
        return (h, c), h

    h0 = jnp.zeros((H,), jnp.float32)
    _, hs = lax.scan(step, (h0, h0), x2d)
    z0 = hs @ params["w0"].T + params["b0"]
    z1 = z0 @ params["w1"].T + params["b1"]
    return jax.nn.softmax(z1, axis=1)


def _init_params(key, feat, H, C):
    ks = jax.random.split(key, 8)
    s = 1.0 / jnp.sqrt(H)
    u = lambda k, shape: jax.random.uniform(k, shape, jnp.float32, -s, s)
    return {
        "w_ih": u(ks[0], (4 * H, feat)),
        "w_hh": u(ks[1], (4 * H, H)),
        "b_ih": u(ks[2], (4 * H,)),
        "b_hh": u(ks[3], (4 * H,)),
        "w0": u(ks[4], (1, H)),
        "b0": u(ks[5], (1,)),
        "w1": u(ks[6], (C, 1)),
        "b1": u(ks[7], (C,)),
    }


if __name__ == "__main__":
    # Shapes consistent with the module: input_dim=[seq, feat], batch=1,
    # rnn_hidden=2 (default), classes=3.
    SEQ, FEAT, HIDDEN, CLASSES = 8, 4, 2, 3

    key = jax.random.PRNGKey(0)
    k_x, k_p, k_x2 = jax.random.split(key, 3)
    x = jax.random.normal(k_x, (1, SEQ, FEAT), jnp.float32)
    params = _init_params(k_p, FEAT, HIDDEN, CLASSES)

    out = jax.block_until_ready(occupancy_baseline_forward(x, params))
    ref = _reference_forward(x, params)

    assert out.shape == (SEQ, CLASSES)
    assert jnp.allclose(out, ref, atol=1e-3, rtol=1e-3), "mismatch vs reference"
    assert jnp.allclose(jnp.sum(out, axis=1), 1.0, atol=1e-3), "rows not normalized"

    # Exercise the multi-tile path: state carried across grid steps + the
    # lane-dense (C, tile) output blocks with 128-aligned tiles.
    SEQ2 = 272
    x2 = jax.random.normal(k_x2, (1, SEQ2, FEAT), jnp.float32)
    out2 = jax.block_until_ready(
        occupancy_baseline_forward(x2, params, seq_tile=128))
    ref2 = _reference_forward(x2, params)
    assert out2.shape == (SEQ2, CLASSES)
    assert jnp.allclose(out2, ref2, atol=1e-3, rtol=1e-3), "multi-tile mismatch"

    print("KERNEL_OK")
</pallas_src>

<mosaic_0001>
module attributes {stable_mosaic.version = 11 : i64} {
  func.func @_lstm_head_kernel(%arg0: i32, %arg1: memref<8x4xf32, #tpu.memory_space<vmem>>, %arg2: memref<4x8xf32, #tpu.memory_space<vmem>>, %arg3: memref<2x8xf32, #tpu.memory_space<vmem>>, %arg4: memref<1x8xf32, #tpu.memory_space<vmem>>, %arg5: memref<3x2xf32, #tpu.memory_space<vmem>>, %arg6: memref<3x1xf32, #tpu.memory_space<vmem>>, %arg7: memref<3x8xf32, #tpu.memory_space<vmem>>, %arg8: memref<1x2xf32, #tpu.memory_space<vmem>>, %arg9: memref<1x2xf32, #tpu.memory_space<vmem>>, %arg10: memref<8x8xf32, #tpu.memory_space<vmem>>, %arg11: memref<8x2xf32, #tpu.memory_space<vmem>>) attributes {dimension_semantics = [#tpu.dimension_semantics<arbitrary>], iteration_bounds = array<i64: 1>, scalar_prefetch = 0 : i64, scratch_operands = 4 : i64, tpu.core_type = #tpu.core_type<tc>, window_params = [{transform_indices = @transform_0, window_bounds = array<i64: 8, 4>}, {pipeline_mode = #tpu.pipeline_mode<synchronous>, transform_indices = @transform_1, window_bounds = array<i64: 4, 8>}, {pipeline_mode = #tpu.pipeline_mode<synchronous>, transform_indices = @transform_2, window_bounds = array<i64: 2, 8>}, {pipeline_mode = #tpu.pipeline_mode<synchronous>, transform_indices = @transform_3, window_bounds = array<i64: 1, 8>}, {pipeline_mode = #tpu.pipeline_mode<synchronous>, transform_indices = @transform_4, window_bounds = array<i64: 3, 2>}, {pipeline_mode = #tpu.pipeline_mode<synchronous>, transform_indices = @transform_5, window_bounds = array<i64: 3, 1>}, {transform_indices = @transform_6, window_bounds = array<i64: 3, 8>}]} {
    %c0_i32 = arith.constant 0 : i32
    %0 = arith.cmpi eq, %arg0, %c0_i32 : i32
    %1 = arith.extui %0 : i1 to i32
    %c0_i32_0 = arith.constant 0 : i32
    %2 = arith.cmpi ne, %1, %c0_i32_0 : i32
    scf.if %2 {
      %cst_62 = arith.constant 0.000000e+00 : f32
      %293 = vector.broadcast %cst_62 : f32 to vector<1x2xf32>
      %c0_63 = arith.constant 0 : index
      %c0_64 = arith.constant 0 : index
      %294 = vector.load %arg8[%c0_63, %c0_64] : memref<1x2xf32, #tpu.memory_space<vmem>>, vector<1x2xf32>
      tpu.vector_store %arg8[%c0_63, %c0_64], %293 {strides = array<i32>} : memref<1x2xf32, #tpu.memory_space<vmem>>, vector<1x2xf32>,
      %cst_65 = arith.constant 0.000000e+00 : f32
      %295 = vector.broadcast %cst_65 : f32 to vector<1x2xf32>
      %c0_66 = arith.constant 0 : index
      %c0_67 = arith.constant 0 : index
      %296 = vector.load %arg9[%c0_66, %c0_67] : memref<1x2xf32, #tpu.memory_space<vmem>>, vector<1x2xf32>
      tpu.vector_store %arg9[%c0_66, %c0_67], %295 {strides = array<i32>} : memref<1x2xf32, #tpu.memory_space<vmem>>, vector<1x2xf32>,
    } else {
    }
    %c0 = arith.constant 0 : index
    %c0_1 = arith.constant 0 : index
    %3 = vector.load %arg1[%c0, %c0_1] : memref<8x4xf32, #tpu.memory_space<vmem>>, vector<8x4xf32>
    %c0_2 = arith.constant 0 : index
    %c0_3 = arith.constant 0 : index
    %4 = vector.load %arg2[%c0_2, %c0_3] : memref<4x8xf32, #tpu.memory_space<vmem>>, vector<4x8xf32>
    %cst = arith.constant dense<0.000000e+00> : vector<8x8xf32>
    %5 = tpu.matmul %3, %4, %cst {dimension_numbers = #tpu.dot_dimension_numbers<[1], [0], [0], [1], [0, 0, 1, 1], [], []>} : vector<8x4xf32>, vector<4x8xf32>, vector<8x8xf32> -> vector<8x8xf32>
    %c0_4 = arith.constant 0 : index
    %c0_5 = arith.constant 0 : index
    %6 = vector.load %arg4[%c0_4, %c0_5] : memref<1x8xf32, #tpu.memory_space<vmem>>, vector<1x8xf32>
    %7 = vector.broadcast %6 : vector<1x8xf32> to vector<8x8xf32>
    %8 = arith.addf %5, %7 : vector<8x8xf32>
    %c0_6 = arith.constant 0 : index
    %c0_7 = arith.constant 0 : index
    %9 = vector.load %arg10[%c0_6, %c0_7] : memref<8x8xf32, #tpu.memory_space<vmem>>, vector<8x8xf32>
    tpu.vector_store %arg10[%c0_6, %c0_7], %8 {strides = array<i32>} : memref<8x8xf32, #tpu.memory_space<vmem>>, vector<8x8xf32>,
    %10 = tpu.iota {dimensions = array<i32: 1>} : vector<1x8xi32>
    %c4_i32 = arith.constant 4 : i32
    %11 = vector.broadcast %c4_i32 : i32 to vector<1x8xi32>
    %12 = arith.cmpi sge, %10, %11 : vector<1x8xi32>
    %c6_i32 = arith.constant 6 : i32
    %13 = vector.broadcast %c6_i32 : i32 to vector<1x8xi32>
    %14 = arith.cmpi slt, %10, %13 : vector<1x8xi32>
    %15 = arith.andi %12, %14 : vector<1x8xi1>
    %cst_8 = arith.constant 2.000000e+00 : f32
    %cst_9 = arith.constant 1.000000e+00 : f32
    %16 = vector.broadcast %cst_8 : f32 to vector<1x8xf32>
    %17 = vector.broadcast %cst_9 : f32 to vector<1x8xf32>
    %18 = arith.select %15, %16, %17 : vector<1x8xi1>, vector<1x8xf32>
    %cst_10 = arith.constant -1.000000e+00 : f32
    %cst_11 = arith.constant 0.000000e+00 : f32
    %19 = vector.broadcast %cst_10 : f32 to vector<1x8xf32>
    %20 = vector.broadcast %cst_11 : f32 to vector<1x8xf32>
    %21 = arith.select %15, %19, %20 : vector<1x8xi1>, vector<1x8xf32>
    %c0_12 = arith.constant 0 : index
    %c0_13 = arith.constant 0 : index
    %22 = vector.load %arg3[%c0_12, %c0_13] : memref<2x8xf32, #tpu.memory_space<vmem>>, vector<2x8xf32>
    %c0_14 = arith.constant 0 : index
    %c0_15 = arith.constant 0 : index
    %23 = vector.load %arg8[%c0_14, %c0_15] : memref<1x2xf32, #tpu.memory_space<vmem>>, vector<1x2xf32>
    %c0_16 = arith.constant 0 : index
    %c0_17 = arith.constant 0 : index
    %24 = vector.load %arg9[%c0_16, %c0_17] : memref<1x2xf32, #tpu.memory_space<vmem>>, vector<1x2xf32>
    %c0_i32_18 = arith.constant 0 : i32
    %c8_i32 = arith.constant 8 : i32
    %25 = arith.muli %c0_i32_18, %c8_i32 : i32
    %26 = tpu.assume_multiple %25, 8 : i32
    %c0_i32_19 = arith.constant 0 : i32
    %27 = arith.addi %26, %c0_i32_19 : i32
    %28 = arith.index_cast %27 : i32 to index
    %c0_20 = arith.constant 0 : index
    %29 = vector.load %arg10[%28, %c0_20] : memref<8x8xf32, #tpu.memory_space<vmem>>, vector<1x8xf32>
    %30 = vector.extract_strided_slice %23 {offsets = [0, 0], sizes = [1, 1], strides = [1, 1]} : vector<1x2xf32> to vector<1x1xf32>
    %31 = vector.extract_strided_slice %22 {offsets = [0, 0], sizes = [1, 8], strides = [1, 1]} : vector<2x8xf32> to vector<1x8xf32>
    %32 = vector.broadcast %30 : vector<1x1xf32> to vector<1x8xf32>
    %33 = arith.mulf %32, %31 : vector<1x8xf32>
    %34 = vector.extract_strided_slice %23 {offsets = [0, 1], sizes = [1, 1], strides = [1, 1]} : vector<1x2xf32> to vector<1x1xf32>
    %35 = vector.extract_strided_slice %22 {offsets = [1, 0], sizes = [1, 8], strides = [1, 1]} : vector<2x8xf32> to vector<1x8xf32>
    %36 = vector.broadcast %34 : vector<1x1xf32> to vector<1x8xf32>
    %37 = arith.mulf %36, %35 : vector<1x8xf32>
    %38 = arith.addf %33, %37 : vector<1x8xf32>
    %39 = arith.addf %29, %38 : vector<1x8xf32>
    %40 = arith.negf %39 : vector<1x8xf32>
    %41 = math.exp %40 : vector<1x8xf32>
    %cst_21 = arith.constant 1.000000e+00 : f32
    %42 = vector.broadcast %cst_21 : f32 to vector<1x8xf32>
    %43 = arith.addf %42, %41 : vector<1x8xf32>
    %44 = arith.divf %42, %43 : vector<1x8xf32>
    %45 = arith.mulf %44, %18 : vector<1x8xf32>
    %46 = arith.addf %45, %21 : vector<1x8xf32>
    %47 = vector.extract_strided_slice %46 {offsets = [0, 0], sizes = [1, 2], strides = [1, 1]} : vector<1x8xf32> to vector<1x2xf32>
    %48 = vector.extract_strided_slice %46 {offsets = [0, 2], sizes = [1, 2], strides = [1, 1]} : vector<1x8xf32> to vector<1x2xf32>
    %49 = vector.extract_strided_slice %46 {offsets = [0, 4], sizes = [1, 2], strides = [1, 1]} : vector<1x8xf32> to vector<1x2xf32>
    %50 = vector.extract_strided_slice %46 {offsets = [0, 6], sizes = [1, 2], strides = [1, 1]} : vector<1x8xf32> to vector<1x2xf32>
    %51 = arith.mulf %48, %24 : vector<1x2xf32>
    %52 = arith.mulf %47, %49 : vector<1x2xf32>
    %53 = arith.addf %51, %52 : vector<1x2xf32>
    %54 = math.tanh %53 : vector<1x2xf32>
    %55 = arith.mulf %50, %54 : vector<1x2xf32>
    %56 = arith.index_cast %27 : i32 to index
    %c0_22 = arith.constant 0 : index
    %57 = vector.load %arg11[%56, %c0_22] : memref<8x2xf32, #tpu.memory_space<vmem>>, vector<1x2xf32>
    tpu.vector_store %arg11[%56, %c0_22], %55 {strides = array<i32>} : memref<8x2xf32, #tpu.memory_space<vmem>>, vector<1x2xf32>,
    %c1_i32 = arith.constant 1 : i32
    %58 = arith.addi %26, %c1_i32 : i32
    %59 = arith.index_cast %58 : i32 to index
    %c0_23 = arith.constant 0 : index
    %60 = vector.load %arg10[%59, %c0_23] : memref<8x8xf32, #tpu.memory_space<vmem>>, vector<1x8xf32>
    %61 = vector.extract_strided_slice %55 {offsets = [0, 0], sizes = [1, 1], strides = [1, 1]} : vector<1x2xf32> to vector<1x1xf32>
    %62 = vector.extract_strided_slice %22 {offsets = [0, 0], sizes = [1, 8], strides = [1, 1]} : vector<2x8xf32> to vector<1x8xf32>
    %63 = vector.broadcast %61 : vector<1x1xf32> to vector<1x8xf32>
    %64 = arith.mulf %63, %62 : vector<1x8xf32>
    %65 = vector.extract_strided_slice %55 {offsets = [0, 1], sizes = [1, 1], strides = [1, 1]} : vector<1x2xf32> to vector<1x1xf32>
    %66 = vector.extract_strided_slice %22 {offsets = [1, 0], sizes = [1, 8], strides = [1, 1]} : vector<2x8xf32> to vector<1x8xf32>
    %67 = vector.broadcast %65 : vector<1x1xf32> to vector<1x8xf32>
    %68 = arith.mulf %67, %66 : vector<1x8xf32>
    %69 = arith.addf %64, %68 : vector<1x8xf32>
    %70 = arith.addf %60, %69 : vector<1x8xf32>
    %71 = arith.negf %70 : vector<1x8xf32>
    %72 = math.exp %71 : vector<1x8xf32>
    %cst_24 = arith.constant 1.000000e+00 : f32
    %73 = vector.broadcast %cst_24 : f32 to vector<1x8xf32>
    %74 = arith.addf %73, %72 : vector<1x8xf32>
    %75 = arith.divf %73, %74 : vector<1x8xf32>
    %76 = arith.mulf %75, %18 : vector<1x8xf32>
    %77 = arith.addf %76, %21 : vector<1x8xf32>
    %78 = vector.extract_strided_slice %77 {offsets = [0, 0], sizes = [1, 2], strides = [1, 1]} : vector<1x8xf32> to vector<1x2xf32>
    %79 = vector.extract_strided_slice %77 {offsets = [0, 2], sizes = [1, 2], strides = [1, 1]} : vector<1x8xf32> to vector<1x2xf32>
    %80 = vector.extract_strided_slice %77 {offsets = [0, 4], sizes = [1, 2], strides = [1, 1]} : vector<1x8xf32> to vector<1x2xf32>
    %81 = vector.extract_strided_slice %77 {offsets = [0, 6], sizes = [1, 2], strides = [1, 1]} : vector<1x8xf32> to vector<1x2xf32>
    %82 = arith.mulf %79, %53 : vector<1x2xf32>
    %83 = arith.mulf %78, %80 : vector<1x2xf32>
    %84 = arith.addf %82, %83 : vector<1x2xf32>
    %85 = math.tanh %84 : vector<1x2xf32>
    %86 = arith.mulf %81, %85 : vector<1x2xf32>
    %87 = arith.index_cast %58 : i32 to index
    %c0_25 = arith.constant 0 : index
    %88 = vector.load %arg11[%87, %c0_25] : memref<8x2xf32, #tpu.memory_space<vmem>>, vector<1x2xf32>
    tpu.vector_store %arg11[%87, %c0_25], %86 {strides = array<i32>} : memref<8x2xf32, #tpu.memory_space<vmem>>, vector<1x2xf32>,
    %c2_i32 = arith.constant 2 : i32
    %89 = arith.addi %26, %c2_i32 : i32
    %90 = arith.index_cast %89 : i32 to index
    %c0_26 = arith.constant 0 : index
    %91 = vector.load %arg10[%90, %c0_26] : memref<8x8xf32, #tpu.memory_space<vmem>>, vector<1x8xf32>
    %92 = vector.extract_strided_slice %86 {offsets = [0, 0], sizes = [1, 1], strides = [1, 1]} : vector<1x2xf32> to vector<1x1xf32>
    %93 = vector.extract_strided_slice %22 {offsets = [0, 0], sizes = [1, 8], strides = [1, 1]} : vector<2x8xf32> to vector<1x8xf32>
    %94 = vector.broadcast %92 : vector<1x1xf32> to vector<1x8xf32>
    %95 = arith.mulf %94, %93 : vector<1x8xf32>
    %96 = vector.extract_strided_slice %86 {offsets = [0, 1], sizes = [1, 1], strides = [1, 1]} : vector<1x2xf32> to vector<1x1xf32>
    %97 = vector.extract_strided_slice %22 {offsets = [1, 0], sizes = [1, 8], strides = [1, 1]} : vector<2x8xf32> to vector<1x8xf32>
    %98 = vector.broadcast %96 : vector<1x1xf32> to vector<1x8xf32>
    %99 = arith.mulf %98, %97 : vector<1x8xf32>
    %100 = arith.addf %95, %99 : vector<1x8xf32>
    %101 = arith.addf %91, %100 : vector<1x8xf32>
    %102 = arith.negf %101 : vector<1x8xf32>
    %103 = math.exp %102 : vector<1x8xf32>
    %cst_27 = arith.constant 1.000000e+00 : f32
    %104 = vector.broadcast %cst_27 : f32 to vector<1x8xf32>
    %105 = arith.addf %104, %103 : vector<1x8xf32>
    %106 = arith.divf %104, %105 : vector<1x8xf32>
    %107 = arith.mulf %106, %18 : vector<1x8xf32>
    %108 = arith.addf %107, %21 : vector<1x8xf32>
    %109 = vector.extract_strided_slice %108 {offsets = [0, 0], sizes = [1, 2], strides = [1, 1]} : vector<1x8xf32> to vector<1x2xf32>
    %110 = vector.extract_strided_slice %108 {offsets = [0, 2], sizes = [1, 2], strides = [1, 1]} : vector<1x8xf32> to vector<1x2xf32>
    %111 = vector.extract_strided_slice %108 {offsets = [0, 4], sizes = [1, 2], strides = [1, 1]} : vector<1x8xf32> to vector<1x2xf32>
    %112 = vector.extract_strided_slice %108 {offsets = [0, 6], sizes = [1, 2], strides = [1, 1]} : vector<1x8xf32> to vector<1x2xf32>
    %113 = arith.mulf %110, %84 : vector<1x2xf32>
    %114 = arith.mulf %109, %111 : vector<1x2xf32>
    %115 = arith.addf %113, %114 : vector<1x2xf32>
    %116 = math.tanh %115 : vector<1x2xf32>
    %117 = arith.mulf %112, %116 : vector<1x2xf32>
    %118 = arith.index_cast %89 : i32 to index
    %c0_28 = arith.constant 0 : index
    %119 = vector.load %arg11[%118, %c0_28] : memref<8x2xf32, #tpu.memory_space<vmem>>, vector<1x2xf32>
    tpu.vector_store %arg11[%118, %c0_28], %117 {strides = array<i32>} : memref<8x2xf32, #tpu.memory_space<vmem>>, vector<1x2xf32>,
    %c3_i32 = arith.constant 3 : i32
    %120 = arith.addi %26, %c3_i32 : i32
    %121 = arith.index_cast %120 : i32 to index
    %c0_29 = arith.constant 0 : index
    %122 = vector.load %arg10[%121, %c0_29] : memref<8x8xf32, #tpu.memory_space<vmem>>, vector<1x8xf32>
    %123 = vector.extract_strided_slice %117 {offsets = [0, 0], sizes = [1, 1], strides = [1, 1]} : vector<1x2xf32> to vector<1x1xf32>
    %124 = vector.extract_strided_slice %22 {offsets = [0, 0], sizes = [1, 8], strides = [1, 1]} : vector<2x8xf32> to vector<1x8xf32>
    %125 = vector.broadcast %123 : vector<1x1xf32> to vector<1x8xf32>
    %126 = arith.mulf %125, %124 : vector<1x8xf32>
    %127 = vector.extract_strided_slice %117 {offsets = [0, 1], sizes = [1, 1], strides = [1, 1]} : vector<1x2xf32> to vector<1x1xf32>
    %128 = vector.extract_strided_slice %22 {offsets = [1, 0], sizes = [1, 8], strides = [1, 1]} : vector<2x8xf32> to vector<1x8xf32>
    %129 = vector.broadcast %127 : vector<1x1xf32> to vector<1x8xf32>
    %130 = arith.mulf %129, %128 : vector<1x8xf32>
    %131 = arith.addf %126, %130 : vector<1x8xf32>
    %132 = arith.addf %122, %131 : vector<1x8xf32>
    %133 = arith.negf %132 : vector<1x8xf32>
    %134 = math.exp %133 : vector<1x8xf32>
    %cst_30 = arith.constant 1.000000e+00 : f32
    %135 = vector.broadcast %cst_30 : f32 to vector<1x8xf32>
    %136 = arith.addf %135, %134 : vector<1x8xf32>
    %137 = arith.divf %135, %136 : vector<1x8xf32>
    %138 = arith.mulf %137, %18 : vector<1x8xf32>
    %139 = arith.addf %138, %21 : vector<1x8xf32>
    %140 = vector.extract_strided_slice %139 {offsets = [0, 0], sizes = [1, 2], strides = [1, 1]} : vector<1x8xf32> to vector<1x2xf32>
    %141 = vector.extract_strided_slice %139 {offsets = [0, 2], sizes = [1, 2], strides = [1, 1]} : vector<1x8xf32> to vector<1x2xf32>
    %142 = vector.extract_strided_slice %139 {offsets = [0, 4], sizes = [1, 2], strides = [1, 1]} : vector<1x8xf32> to vector<1x2xf32>
    %143 = vector.extract_strided_slice %139 {offsets = [0, 6], sizes = [1, 2], strides = [1, 1]} : vector<1x8xf32> to vector<1x2xf32>
    %144 = arith.mulf %141, %115 : vector<1x2xf32>
    %145 = arith.mulf %140, %142 : vector<1x2xf32>
    %146 = arith.addf %144, %145 : vector<1x2xf32>
    %147 = math.tanh %146 : vector<1x2xf32>
    %148 = arith.mulf %143, %147 : vector<1x2xf32>
    %149 = arith.index_cast %120 : i32 to index
    %c0_31 = arith.constant 0 : index
    %150 = vector.load %arg11[%149, %c0_31] : memref<8x2xf32, #tpu.memory_space<vmem>>, vector<1x2xf32>
    tpu.vector_store %arg11[%149, %c0_31], %148 {strides = array<i32>} : memref<8x2xf32, #tpu.memory_space<vmem>>, vector<1x2xf32>,
    %c4_i32_32 = arith.constant 4 : i32
    %151 = arith.addi %26, %c4_i32_32 : i32
    %152 = arith.index_cast %151 : i32 to index
    %c0_33 = arith.constant 0 : index
    %153 = vector.load %arg10[%152, %c0_33] : memref<8x8xf32, #tpu.memory_space<vmem>>, vector<1x8xf32>
    %154 = vector.extract_strided_slice %148 {offsets = [0, 0], sizes = [1, 1], strides = [1, 1]} : vector<1x2xf32> to vector<1x1xf32>
    %155 = vector.extract_strided_slice %22 {offsets = [0, 0], sizes = [1, 8], strides = [1, 1]} : vector<2x8xf32> to vector<1x8xf32>
    %156 = vector.broadcast %154 : vector<1x1xf32> to vector<1x8xf32>
    %157 = arith.mulf %156, %155 : vector<1x8xf32>
    %158 = vector.extract_strided_slice %148 {offsets = [0, 1], sizes = [1, 1], strides = [1, 1]} : vector<1x2xf32> to vector<1x1xf32>
    %159 = vector.extract_strided_slice %22 {offsets = [1, 0], sizes = [1, 8], strides = [1, 1]} : vector<2x8xf32> to vector<1x8xf32>
    %160 = vector.broadcast %158 : vector<1x1xf32> to vector<1x8xf32>
    %161 = arith.mulf %160, %159 : vector<1x8xf32>
    %162 = arith.addf %157, %161 : vector<1x8xf32>
    %163 = arith.addf %153, %162 : vector<1x8xf32>
    %164 = arith.negf %163 : vector<1x8xf32>
    %165 = math.exp %164 : vector<1x8xf32>
    %cst_34 = arith.constant 1.000000e+00 : f32
    %166 = vector.broadcast %cst_34 : f32 to vector<1x8xf32>
    %167 = arith.addf %166, %165 : vector<1x8xf32>
    %168 = arith.divf %166, %167 : vector<1x8xf32>
    %169 = arith.mulf %168, %18 : vector<1x8xf32>
    %170 = arith.addf %169, %21 : vector<1x8xf32>
    %171 = vector.extract_strided_slice %170 {offsets = [0, 0], sizes = [1, 2], strides = [1, 1]} : vector<1x8xf32> to vector<1x2xf32>
    %172 = vector.extract_strided_slice %170 {offsets = [0, 2], sizes = [1, 2], strides = [1, 1]} : vector<1x8xf32> to vector<1x2xf32>
    %173 = vector.extract_strided_slice %170 {offsets = [0, 4], sizes = [1, 2], strides = [1, 1]} : vector<1x8xf32> to vector<1x2xf32>
    %174 = vector.extract_strided_slice %170 {offsets = [0, 6], sizes = [1, 2], strides = [1, 1]} : vector<1x8xf32> to vector<1x2xf32>
    %175 = arith.mulf %172, %146 : vector<1x2xf32>
    %176 = arith.mulf %171, %173 : vector<1x2xf32>
    %177 = arith.addf %175, %176 : vector<1x2xf32>
    %178 = math.tanh %177 : vector<1x2xf32>
    %179 = arith.mulf %174, %178 : vector<1x2xf32>
    %180 = arith.index_cast %151 : i32 to index
    %c0_35 = arith.constant 0 : index
    %181 = vector.load %arg11[%180, %c0_35] : memref<8x2xf32, #tpu.memory_space<vmem>>, vector<1x2xf32>
    tpu.vector_store %arg11[%180, %c0_35], %179 {strides = array<i32>} : memref<8x2xf32, #tpu.memory_space<vmem>>, vector<1x2xf32>,
    %c5_i32 = arith.constant 5 : i32
    %182 = arith.addi %26, %c5_i32 : i32
    %183 = arith.index_cast %182 : i32 to index
    %c0_36 = arith.constant 0 : index
    %184 = vector.load %arg10[%183, %c0_36] : memref<8x8xf32, #tpu.memory_space<vmem>>, vector<1x8xf32>
    %185 = vector.extract_strided_slice %179 {offsets = [0, 0], sizes = [1, 1], strides = [1, 1]} : vector<1x2xf32> to vector<1x1xf32>
    %186 = vector.extract_strided_slice %22 {offsets = [0, 0], sizes = [1, 8], strides = [1, 1]} : vector<2x8xf32> to vector<1x8xf32>
    %187 = vector.broadcast %185 : vector<1x1xf32> to vector<1x8xf32>
    %188 = arith.mulf %187, %186 : vector<1x8xf32>
    %189 = vector.extract_strided_slice %179 {offsets = [0, 1], sizes = [1, 1], strides = [1, 1]} : vector<1x2xf32> to vector<1x1xf32>
    %190 = vector.extract_strided_slice %22 {offsets = [1, 0], sizes = [1, 8], strides = [1, 1]} : vector<2x8xf32> to vector<1x8xf32>
    %191 = vector.broadcast %189 : vector<1x1xf32> to vector<1x8xf32>
    %192 = arith.mulf %191, %190 : vector<1x8xf32>
    %193 = arith.addf %188, %192 : vector<1x8xf32>
    %194 = arith.addf %184, %193 : vector<1x8xf32>
    %195 = arith.negf %194 : vector<1x8xf32>
    %196 = math.exp %195 : vector<1x8xf32>
    %cst_37 = arith.constant 1.000000e+00 : f32
    %197 = vector.broadcast %cst_37 : f32 to vector<1x8xf32>
    %198 = arith.addf %197, %196 : vector<1x8xf32>
    %199 = arith.divf %197, %198 : vector<1x8xf32>
    %200 = arith.mulf %199, %18 : vector<1x8xf32>
    %201 = arith.addf %200, %21 : vector<1x8xf32>
    %202 = vector.extract_strided_slice %201 {offsets = [0, 0], sizes = [1, 2], strides = [1, 1]} : vector<1x8xf32> to vector<1x2xf32>
    %203 = vector.extract_strided_slice %201 {offsets = [0, 2], sizes = [1, 2], strides = [1, 1]} : vector<1x8xf32> to vector<1x2xf32>
    %204 = vector.extract_strided_slice %201 {offsets = [0, 4], sizes = [1, 2], strides = [1, 1]} : vector<1x8xf32> to vector<1x2xf32>
    %205 = vector.extract_strided_slice %201 {offsets = [0, 6], sizes = [1, 2], strides = [1, 1]} : vector<1x8xf32> to vector<1x2xf32>
    %206 = arith.mulf %203, %177 : vector<1x2xf32>
    %207 = arith.mulf %202, %204 : vector<1x2xf32>
    %208 = arith.addf %206, %207 : vector<1x2xf32>
    %209 = math.tanh %208 : vector<1x2xf32>
    %210 = arith.mulf %205, %209 : vector<1x2xf32>
    %211 = arith.index_cast %182 : i32 to index
    %c0_38 = arith.constant 0 : index
    %212 = vector.load %arg11[%211, %c0_38] : memref<8x2xf32, #tpu.memory_space<vmem>>, vector<1x2xf32>
    tpu.vector_store %arg11[%211, %c0_38], %210 {strides = array<i32>} : memref<8x2xf32, #tpu.memory_space<vmem>>, vector<1x2xf32>,
    %c6_i32_39 = arith.constant 6 : i32
    %213 = arith.addi %26, %c6_i32_39 : i32
    %214 = arith.index_cast %213 : i32 to index
    %c0_40 = arith.constant 0 : index
    %215 = vector.load %arg10[%214, %c0_40] : memref<8x8xf32, #tpu.memory_space<vmem>>, vector<1x8xf32>
    %216 = vector.extract_strided_slice %210 {offsets = [0, 0], sizes = [1, 1], strides = [1, 1]} : vector<1x2xf32> to vector<1x1xf32>
    %217 = vector.extract_strided_slice %22 {offsets = [0, 0], sizes = [1, 8], strides = [1, 1]} : vector<2x8xf32> to vector<1x8xf32>
    %218 = vector.broadcast %216 : vector<1x1xf32> to vector<1x8xf32>
    %219 = arith.mulf %218, %217 : vector<1x8xf32>
    %220 = vector.extract_strided_slice %210 {offsets = [0, 1], sizes = [1, 1], strides = [1, 1]} : vector<1x2xf32> to vector<1x1xf32>
    %221 = vector.extract_strided_slice %22 {offsets = [1, 0], sizes = [1, 8], strides = [1, 1]} : vector<2x8xf32> to vector<1x8xf32>
    %222 = vector.broadcast %220 : vector<1x1xf32> to vector<1x8xf32>
    %223 = arith.mulf %222, %221 : vector<1x8xf32>
    %224 = arith.addf %219, %223 : vector<1x8xf32>
    %225 = arith.addf %215, %224 : vector<1x8xf32>
    %226 = arith.negf %225 : vector<1x8xf32>
    %227 = math.exp %226 : vector<1x8xf32>
    %cst_41 = arith.constant 1.000000e+00 : f32
    %228 = vector.broadcast %cst_41 : f32 to vector<1x8xf32>
    %229 = arith.addf %228, %227 : vector<1x8xf32>
    %230 = arith.divf %228, %229 : vector<1x8xf32>
    %231 = arith.mulf %230, %18 : vector<1x8xf32>
    %232 = arith.addf %231, %21 : vector<1x8xf32>
    %233 = vector.extract_strided_slice %232 {offsets = [0, 0], sizes = [1, 2], strides = [1, 1]} : vector<1x8xf32> to vector<1x2xf32>
    %234 = vector.extract_strided_slice %232 {offsets = [0, 2], sizes = [1, 2], strides = [1, 1]} : vector<1x8xf32> to vector<1x2xf32>
    %235 = vector.extract_strided_slice %232 {offsets = [0, 4], sizes = [1, 2], strides = [1, 1]} : vector<1x8xf32> to vector<1x2xf32>
    %236 = vector.extract_strided_slice %232 {offsets = [0, 6], sizes = [1, 2], strides = [1, 1]} : vector<1x8xf32> to vector<1x2xf32>
    %237 = arith.mulf %234, %208 : vector<1x2xf32>
    %238 = arith.mulf %233, %235 : vector<1x2xf32>
    %239 = arith.addf %237, %238 : vector<1x2xf32>
    %240 = math.tanh %239 : vector<1x2xf32>
    %241 = arith.mulf %236, %240 : vector<1x2xf32>
    %242 = arith.index_cast %213 : i32 to index
    %c0_42 = arith.constant 0 : index
    %243 = vector.load %arg11[%242, %c0_42] : memref<8x2xf32, #tpu.memory_space<vmem>>, vector<1x2xf32>
    tpu.vector_store %arg11[%242, %c0_42], %241 {strides = array<i32>} : memref<8x2xf32, #tpu.memory_space<vmem>>, vector<1x2xf32>,
    %c7_i32 = arith.constant 7 : i32
    %244 = arith.addi %26, %c7_i32 : i32
    %245 = arith.index_cast %244 : i32 to index
    %c0_43 = arith.constant 0 : index
    %246 = vector.load %arg10[%245, %c0_43] : memref<8x8xf32, #tpu.memory_space<vmem>>, vector<1x8xf32>
    %247 = vector.extract_strided_slice %241 {offsets = [0, 0], sizes = [1, 1], strides = [1, 1]} : vector<1x2xf32> to vector<1x1xf32>
    %248 = vector.extract_strided_slice %22 {offsets = [0, 0], sizes = [1, 8], strides = [1, 1]} : vector<2x8xf32> to vector<1x8xf32>
    %249 = vector.broadcast %247 : vector<1x1xf32> to vector<1x8xf32>
    %250 = arith.mulf %249, %248 : vector<1x8xf32>
    %251 = vector.extract_strided_slice %241 {offsets = [0, 1], sizes = [1, 1], strides = [1, 1]} : vector<1x2xf32> to vector<1x1xf32>
    %252 = vector.extract_strided_slice %22 {offsets = [1, 0], sizes = [1, 8], strides = [1, 1]} : vector<2x8xf32> to vector<1x8xf32>
    %253 = vector.broadcast %251 : vector<1x1xf32> to vector<1x8xf32>
    %254 = arith.mulf %253, %252 : vector<1x8xf32>
    %255 = arith.addf %250, %254 : vector<1x8xf32>
    %256 = arith.addf %246, %255 : vector<1x8xf32>
    %257 = arith.negf %256 : vector<1x8xf32>
    %258 = math.exp %257 : vector<1x8xf32>
    %cst_44 = arith.constant 1.000000e+00 : f32
    %259 = vector.broadcast %cst_44 : f32 to vector<1x8xf32>
    %260 = arith.addf %259, %258 : vector<1x8xf32>
    %261 = arith.divf %259, %260 : vector<1x8xf32>
    %262 = arith.mulf %261, %18 : vector<1x8xf32>
    %263 = arith.addf %262, %21 : vector<1x8xf32>
    %264 = vector.extract_strided_slice %263 {offsets = [0, 0], sizes = [1, 2], strides = [1, 1]} : vector<1x8xf32> to vector<1x2xf32>
    %265 = vector.extract_strided_slice %263 {offsets = [0, 2], sizes = [1, 2], strides = [1, 1]} : vector<1x8xf32> to vector<1x2xf32>
    %266 = vector.extract_strided_slice %263 {offsets = [0, 4], sizes = [1, 2], strides = [1, 1]} : vector<1x8xf32> to vector<1x2xf32>
    %267 = vector.extract_strided_slice %263 {offsets = [0, 6], sizes = [1, 2], strides = [1, 1]} : vector<1x8xf32> to vector<1x2xf32>
    %268 = arith.mulf %265, %239 : vector<1x2xf32>
    %269 = arith.mulf %264, %266 : vector<1x2xf32>
    %270 = arith.addf %268, %269 : vector<1x2xf32>
    %271 = math.tanh %270 : vector<1x2xf32>
    %272 = arith.mulf %267, %271 : vector<1x2xf32>
    %273 = arith.index_cast %244 : i32 to index
    %c0_45 = arith.constant 0 : index
    %274 = vector.load %arg11[%273, %c0_45] : memref<8x2xf32, #tpu.memory_space<vmem>>, vector<1x2xf32>
    tpu.vector_store %arg11[%273, %c0_45], %272 {strides = array<i32>} : memref<8x2xf32, #tpu.memory_space<vmem>>, vector<1x2xf32>,
    %c1_i32_46 = arith.constant 1 : i32
    %c0_47 = arith.constant 0 : index
    %c0_48 = arith.constant 0 : index
    %275 = vector.load %arg8[%c0_47, %c0_48] : memref<1x2xf32, #tpu.memory_space<vmem>>, vector<1x2xf32>
    tpu.vector_store %arg8[%c0_47, %c0_48], %272 {strides = array<i32>} : memref<1x2xf32, #tpu.memory_space<vmem>>, vector<1x2xf32>,
    %c0_49 = arith.constant 0 : index
    %c0_50 = arith.constant 0 : index
    %276 = vector.load %arg9[%c0_49, %c0_50] : memref<1x2xf32, #tpu.memory_space<vmem>>, vector<1x2xf32>
    tpu.vector_store %arg9[%c0_49, %c0_50], %270 {strides = array<i32>} : memref<1x2xf32, #tpu.memory_space<vmem>>, vector<1x2xf32>,
    %c0_51 = arith.constant 0 : index
    %c0_52 = arith.constant 0 : index
    %277 = vector.load %arg5[%c0_51, %c0_52] : memref<3x2xf32, #tpu.memory_space<vmem>>, vector<3x2xf32>
    %c0_53 = arith.constant 0 : index
    %c0_54 = arith.constant 0 : index
    %278 = vector.load %arg11[%c0_53, %c0_54] : memref<8x2xf32, #tpu.memory_space<vmem>>, vector<8x2xf32>
    %cst_55 = arith.constant dense<0.000000e+00> : vector<3x8xf32>
    %279 = tpu.matmul %277, %278, %cst_55 {dimension_numbers = #tpu.dot_dimension_numbers<[1], [1], [0], [0], [0, 0, 1, 0], [], []>} : vector<3x2xf32>, vector<8x2xf32>, vector<3x8xf32> -> vector<3x8xf32>
    %c0_56 = arith.constant 0 : index
    %c0_57 = arith.constant 0 : index
    %280 = vector.load %arg6[%c0_56, %c0_57] : memref<3x1xf32, #tpu.memory_space<vmem>>, vector<3x1xf32>
    %281 = vector.broadcast %280 : vector<3x1xf32> to vector<3x8xf32>
    %282 = arith.addf %279, %281 : vector<3x8xf32>
    %cst_58 = arith.constant dense<0xFF800000> : vector<8xf32>
    %283 = vector.multi_reduction <maximumf>, %282, %cst_58 [0] : vector<3x8xf32> to vector<8xf32>
    %284 = vector.shape_cast %283 : vector<8xf32> to vector<1x8xf32>
    %285 = vector.broadcast %284 : vector<1x8xf32> to vector<3x8xf32>
    %286 = arith.subf %282, %285 : vector<3x8xf32>
    %287 = math.exp %286 : vector<3x8xf32>
    %cst_59 = arith.constant dense<0.000000e+00> : vector<8xf32>
    %288 = vector.multi_reduction <add>, %287, %cst_59 [0] : vector<3x8xf32> to vector<8xf32>
    %289 = vector.shape_cast %288 : vector<8xf32> to vector<1x8xf32>
    %290 = vector.broadcast %289 : vector<1x8xf32> to vector<3x8xf32>
    %291 = arith.divf %287, %290 : vector<3x8xf32>
    %c0_60 = arith.constant 0 : index
    %c0_61 = arith.constant 0 : index
    %292 = vector.load %arg7[%c0_60, %c0_61] : memref<3x8xf32, #tpu.memory_space<vmem>>, vector<3x8xf32>
    tpu.vector_store %arg7[%c0_60, %c0_61], %291 {strides = array<i32>} : memref<3x8xf32, #tpu.memory_space<vmem>>, vector<3x8xf32>,
    return
  }
  func.func @transform_0(%arg0: i32) -> (i32, i32) {
    %c0_i32 = arith.constant 0 : i32
    %c0_i32_0 = arith.constant 0 : i32
    return %arg0, %c0_i32 : i32, i32
  }
  func.func @transform_1(%arg0: i32) -> (i32, i32) {
    %c0_i32 = arith.constant 0 : i32
    %c0_i32_0 = arith.constant 0 : i32
    %c0_i32_1 = arith.constant 0 : i32
    return %c0_i32, %c0_i32_0 : i32, i32
  }
  func.func @transform_2(%arg0: i32) -> (i32, i32) {
    %c0_i32 = arith.constant 0 : i32
    %c0_i32_0 = arith.constant 0 : i32
    %c0_i32_1 = arith.constant 0 : i32
    return %c0_i32, %c0_i32_0 : i32, i32
  }
  func.func @transform_3(%arg0: i32) -> (i32, i32) {
    %c0_i32 = arith.constant 0 : i32
    %c0_i32_0 = arith.constant 0 : i32
    %c0_i32_1 = arith.constant 0 : i32
    return %c0_i32, %c0_i32_0 : i32, i32
  }
  func.func @transform_4(%arg0: i32) -> (i32, i32) {
    %c0_i32 = arith.constant 0 : i32
    %c0_i32_0 = arith.constant 0 : i32
    %c0_i32_1 = arith.constant 0 : i32
    return %c0_i32, %c0_i32_0 : i32, i32
  }
  func.func @transform_5(%arg0: i32) -> (i32, i32) {
    %c0_i32 = arith.constant 0 : i32
    %c0_i32_0 = arith.constant 0 : i32
    %c0_i32_1 = arith.constant 0 : i32
    return %c0_i32, %c0_i32_0 : i32, i32
  }
  func.func @transform_6(%arg0: i32) -> (i32, i32) {
    %c0_i32 = arith.constant 0 : i32
    %c0_i32_0 = arith.constant 0 : i32
    return %c0_i32, %arg0 : i32, i32
  }
}

</mosaic_0001>

<bundles_post_ra>
// kernel: tpu_custom_call.1
= control target key start
LH: loop header
LB: loop body
LE: loop exit
PB: predicated region body
PF: predicated region fallthrough
CT: control target
= control target key end

     0   :  { %vm28_vm0 = vcmask 8192   ;;  %vm44_vm1 = vcmask 1043456   ;;  %v785_v1 = vmov 0.0   ;;  %vm786_vm2 = vmmov 0   ;;  %s975_s0 = inlined_call_operand.vmem [shape: f32[8,4], index: 0, kind: input, shape index: {}]   ;;  %s976_s1 = inlined_call_operand.vmem [shape: f32[4,8], index: 1, kind: input, shape index: {}]   ;;  %s977_s2 = inlined_call_operand.vmem [shape: f32[2,8], index: 2, kind: input, shape index: {}]   ;;  %s978_s3 = inlined_call_operand.vmem [shape: f32[1,8], index: 3, kind: input, shape index: {}]   ;;  %s979_s4 = inlined_call_operand.vmem [shape: f32[3,2], index: 4, kind: input, shape index: {}]   ;;  %s980_s5 = inlined_call_operand.vmem [shape: f32[3,1], index: 5, kind: input, shape index: {}]   ;;  %s981_s6 = inlined_call_operand.hbm [shape: f32[3,8], index: 6, kind: output, shape index: {}]  }
   0x1   :  { %v32_v0 = vld [vmem:[%s976_s1] sm:$0xf]  ;;  %29 = vst.msk [vmem:[#allocation2] sm:$0x1] %vm28_vm0, %v785_v1  ;;  %30 = vst.msk [vmem:[#allocation3] sm:$0x1] %vm28_vm0, %v785_v1  ;;  %677 = vmatprep.subr.mxu0 %v785_v1  ;;  %679 = vmatprep.mubr.msk.f32.mxu0 %vm786_vm2, %v785_v1 }
   0x2   :  { %v31_v2 = vld [vmem:[%s975_s0] sm:$0xff]  ;;  %vm40_vm3 = vcmask 31744   ;;  %678 = vmatpush3.msk.msra.mxu0 %vm44_vm1, %v32_v0  ;;  %v787_v3 = vmov 1  }
   0x3   :  { %700 = vset.pattern.permute.xlu0 %v787_v3 }
   0x4   :  { %11 = vsyncpa [#allocation7], 0  ;;  %680 = vmatmul.mubr.msk.f32.vlgmr.msra.gmra.mxu0 %vm40_vm3, %v31_v2  ;;  %682 = vmatprep.subr.mxu1 %v785_v1  ;;  %v788_v5 = vmov 0   ;;  %v120_v6 = vlaneseq  ;;  %v845_v11 = vld [vmem:[%s977_s2] sm:$0x3]  ;;  %vm118_vm4 = vcmask 64512  }
   0x5   :  { %684 = vmatprep.mubr.msk.f32.mxu1 %vm786_vm2, %v785_v1  ;;  %v659_v12 = vld [vmem:[%s978_s3] ss:$0 sm:$0xff]  ;;  %v789_v28 = vmov 1.0   ;;  %s790_s2 = smov 124   ;;  %s791_s3 = smov 2   ;;  %v792_v41 = vmov 6  }
   0x6   :  { %v137_v7 = vshrl.u32 %v120_v6, 7  ;;  %v121_v27 = vand.u32 127, %v120_v6  ;;  %702 = vset.pattern.permute.xlu1 %v792_v41  ;;  %v793_v42 = vmov 7   ;;  %s794_s27 = smov 4   ;;  %v869_v46 = vrot.slane %v845_v11, 1  ;;  %s795_s28 = smov 122  }
   0x7   :  { %s796_s7 = smov 126   ;;  %vm533_vm8 = vcmask 15360   ;;  %vm610_vm9 = vcmask 59392  }
   0x8   :  { %v128_v4 = vld [vmem:[#allocation2] sm:$0x1]  ;;  %v138_v9 = vsub.s32 0, %v137_v7  ;;  %vm122_vm5 = vcmp.ge.s32.totalorder %v121_v27, 4  ;;  %vm123_vm6 = vcmp.lt.s32.totalorder %v121_v27, 6 }
   0x9   :  { %142 = vperm.xlu0 %700, %v128_v4   ;;  %vm124_vm7 = vmand %vm122_vm5, %vm123_vm6  ;;  %v663_v34 = vld [vmem:[#allocation3] ss:$0 sm:$0xff] }
   0xa   :  { %v852_v29 = vsel %vm124_vm7, 2.0, %v789_v28  ;;  %v854_v31 = vsel %vm124_vm7, -1.0, %v785_v1 }
   0xd   :  { %701 = vset.pattern.permute.xlu0 %v788_v5 }
   0xe   :  { %133 = vperm.xlu0 %701, %v128_v4  }
  0x12   :  { %703 = vset.pattern.permute.xlu0 %v793_v42 }
  0x84   :  { %v143_v8 = vpop.permute.xlu0 %142 }
  0x85   :  { %v148_v10 = vrot.slane %v143_v8, %v138_v9 }
  0x87   :  { %v149_v15 = vmul.f32 %v148_v10, %v845_v11 }
  0x89   :  { %v134_v13 = vpop.permute.xlu0 %133  ;;  %v151_v19 = vrot.slane %v149_v15, 1 }
  0x8a   :  { %v139_v17 = vrot.slane %v134_v13, %v138_v9 }
  0x8c   :  { %v140_v20 = vmul.f32 %v139_v17, %v845_v11 }
  0x8e   :  { %v153_v21 = vadd.f32 %v151_v19, %v140_v20 }
  0xc4   :  { %v114_v14 = vpop.f32.mrf.mxu0 }
  0xc5   :  { %v115_v16 = vadd.f32 %v659_v12, %v114_v14 }
  0xc6   :  { %v681_v18 = vpop.f32.mrf.mxu0 }
  0xc7   :  { %119 = vst.msk [vmem:[#allocation4] sm:$0xff] %vm118_vm4, %v115_v16 }
  0xce   :  { %v130_v22 = vld [vmem:[#allocation4] sm:$0x1]  ;;  %v196_v52 = vld [vmem:[#allocation4 + $0x1] sm:$0x1]  ;;  %v245_v10 = vld [vmem:[#allocation4 + $0x2] sm:$0x1] }
  0xcf   :  { %v154_v23 = vadd.f32 %v153_v21, %v130_v22 }
  0xd1   :  { %v662_v24 = vmul.f32 -1.442695, %v154_v23 }
  0xd3   :  { %711 = vpow2.f32 %v662_v24 }
  0xe0   :  { %v712_v25 = vpop.eup %711 }
  0xe1   :  { %v158_v26 = vadd.f32 1.0, %v712_v25 }
  0xe3   :  { %713 = vrcp.f32 %v158_v26 }
  0xf0   :  { %v714_v30 = vpop.eup %713 }
  0xf1   :  { %v161_v32 = vmul.f32 %v714_v30, %v852_v29 }
  0xf3   :  { %v162_v33 = vadd.f32 %v161_v32, %v854_v31 }
  0xf5   :  { %173 = vrot.lane.b32.xlu1 %v162_v33, %s790_s2 }
  0xf9   :  { %168 = vrot.lane.b32.xlu1 %v663_v34, %s791_s3  ;;  %v291_v34 = vld [vmem:[#allocation4 + $0x3] sm:$0x1] }
 0x167   :  { %v174_v35 = vpop.permute.xlu1 %173 }
 0x168   :  { %v176_v36 = vmul.f32 %v174_v35, %v162_v33 }
 0x16a   :  { %178 = vrot.lane.b32.xlu1 %v176_v36, %s791_s3 }
 0x16b   :  { %v169_v37 = vpop.permute.xlu1 %168 }
 0x16c   :  { %v171_v38 = vmul.f32 %v169_v37, %v162_v33 }
 0x1dc   :  { %v179_v39 = vpop.permute.xlu1 %178 }
 0x1dd   :  { %v181_v40 = vadd.f32 %v179_v39, %v171_v38 }
 0x1df   :  { %715 = vtanh.f32 %v181_v40 }
 0x1ec   :  { %v716_v43 = vpop.eup %715 }
 0x1ed   :  { %184 = vrot.lane.b32.xlu0 %v716_v43, %s794_s27 }
 0x25f   :  { %v185_v44 = vpop.permute.xlu0 %184 }
 0x260   :  { %v864_v45 = vmul.f32 %v185_v44, %v162_v33 }
 0x262   :  { %203 = vperm.xlu0 %703, %v864_v45   ;;  %198 = vperm.xlu1 %702, %v864_v45  }
 0x2dd   :  { %v204_v47 = vpop.permute.xlu0 %203  ;;  %v199_v48 = vpop.permute.xlu1 %198 }
 0x2de   :  { %v209_v49 = vmul.f32 %v869_v46, %v204_v47  ;;  %v201_v50 = vmul.f32 %v199_v48, %v845_v11 }
 0x2e0   :  { %v210_v51 = vadd.f32 %v209_v49, %v201_v50 }
 0x2e2   :  { %v211_v53 = vadd.f32 %v210_v51, %v196_v52 }
 0x2e4   :  { %v664_v54 = vmul.f32 -1.442695, %v211_v53 }
 0x2e6   :  { %717 = vpow2.f32 %v664_v54 }
 0x2f3   :  { %v718_v55 = vpop.eup %717 }
 0x2f4   :  { %v215_v56 = vadd.f32 1.0, %v718_v55 }
 0x2f6   :  { %719 = vrcp.f32 %v215_v56 }
 0x303   :  { %v720_v57 = vpop.eup %719 }
 0x304   :  { %v218_v58 = vmul.f32 %v720_v57, %v852_v29 }
 0x306   :  { %v219_v59 = vadd.f32 %v218_v58, %v854_v31 }
 0x308   :  { %222 = vrot.lane.b32.xlu1 %v219_v59, %s790_s2  ;;  %v220_v62 = vmul.f32 %v219_v59, %v181_v40 }
 0x37a   :  { %v223_v60 = vpop.permute.xlu1 %222 }
 0x37b   :  { %v225_v61 = vmul.f32 %v223_v60, %v219_v59 }
 0x37d   :  { %227 = vrot.lane.b32.xlu1 %v225_v61, %s791_s3 }
 0x3ef   :  { %v228_v63 = vpop.permute.xlu1 %227 }
 0x3f0   :  { %v230_v0 = vadd.f32 %v228_v63, %v220_v62 }
 0x3f2   :  { %721 = vtanh.f32 %v230_v0 }
 0x3ff   :  { %v722_v1 = vpop.eup %721 }
 0x400   :  { %233 = vrot.lane.b32.xlu0 %v722_v1, %s794_s27 }
 0x472   :  { %v234_v2 = vpop.permute.xlu0 %233 }
 0x473   :  { %v878_v3 = vmul.f32 %v234_v2, %v219_v59  ;;  %v337_v59 = vld [vmem:[#allocation4 + $0x4] sm:$0x1] }
 0x475   :  { %252 = vperm.xlu0 %703, %v878_v3   ;;  %247 = vperm.xlu1 %702, %v878_v3  }
 0x479   :  { %704 = vset.pattern.permute.xlu0 %v792_v41  ;;  %705 = vset.pattern.permute.xlu1 %v793_v42 }
 0x4f0   :  { %v253_v4 = vpop.permute.xlu0 %252  ;;  %v248_v6 = vpop.permute.xlu1 %247 }
 0x4f1   :  { %v255_v7 = vmul.f32 %v253_v4, %v869_v46  ;;  %v250_v8 = vmul.f32 %v248_v6, %v845_v11 }
 0x4f3   :  { %v256_v9 = vadd.f32 %v255_v7, %v250_v8 }
 0x4f5   :  { %v257_v12 = vadd.f32 %v256_v9, %v245_v10 }
 0x4f7   :  { %v665_v13 = vmul.f32 -1.442695, %v257_v12 }
 0x4f9   :  { %723 = vpow2.f32 %v665_v13 }
 0x506   :  { %v724_v14 = vpop.eup %723 }
 0x507   :  { %v261_v15 = vadd.f32 1.0, %v724_v14 }
 0x509   :  { %725 = vrcp.f32 %v261_v15 }
 0x516   :  { %v726_v16 = vpop.eup %725 }
 0x517   :  { %v264_v17 = vmul.f32 %v726_v16, %v852_v29 }
 0x519   :  { %v265_v18 = vadd.f32 %v264_v17, %v854_v31 }
 0x51b   :  { %268 = vrot.lane.b32.xlu1 %v265_v18, %s790_s2  ;;  %v266_v21 = vmul.f32 %v265_v18, %v230_v0 }
 0x58d   :  { %v269_v19 = vpop.permute.xlu1 %268 }
 0x58e   :  { %v271_v20 = vmul.f32 %v269_v19, %v265_v18  ;;  %v383_v19 = vld [vmem:[#allocation4 + $0x5] sm:$0x1] }
 0x590   :  { %273 = vrot.lane.b32.xlu0 %v271_v20, %s791_s3 }
 0x602   :  { %v274_v22 = vpop.permute.xlu0 %273 }
 0x603   :  { %v276_v23 = vadd.f32 %v274_v22, %v266_v21 }
 0x605   :  { %727 = vtanh.f32 %v276_v23 }
 0x612   :  { %v728_v24 = vpop.eup %727 }
 0x613   :  { %279 = vrot.lane.b32.xlu1 %v728_v24, %s794_s27 }
 0x685   :  { %v280_v25 = vpop.permute.xlu1 %279 }
 0x686   :  { %v891_v26 = vmul.f32 %v280_v25, %v265_v18 }
 0x688   :  { %298 = vperm.xlu1 %705, %v891_v26   ;;  %293 = vperm.xlu0 %704, %v891_v26  }
 0x703   :  { %v299_v27 = vpop.permute.xlu1 %298  ;;  %v294_v28 = vpop.permute.xlu0 %293 }
 0x704   :  { %v301_v30 = vmul.f32 %v299_v27, %v869_v46  ;;  %v296_v32 = vmul.f32 %v294_v28, %v845_v11 }
 0x706   :  { %v302_v33 = vadd.f32 %v301_v30, %v296_v32 }
 0x708   :  { %v303_v35 = vadd.f32 %v302_v33, %v291_v34 }
 0x70a   :  { %v666_v36 = vmul.f32 -1.442695, %v303_v35 }
 0x70c   :  { %729 = vpow2.f32 %v666_v36 }
 0x719   :  { %v730_v37 = vpop.eup %729 }
 0x71a   :  { %v307_v38 = vadd.f32 1.0, %v730_v37 }
 0x71c   :  { %731 = vrcp.f32 %v307_v38 }
 0x729   :  { %v732_v39 = vpop.eup %731 }
 0x72a   :  { %v310_v40 = vmul.f32 %v732_v39, %v852_v29 }
 0x72c   :  { %v311_v43 = vadd.f32 %v310_v40, %v854_v31 }
 0x72e   :  { %314 = vrot.lane.b32.xlu1 %v311_v43, %s790_s2  ;;  %v312_v48 = vmul.f32 %v311_v43, %v276_v23 }
 0x7a0   :  { %v315_v44 = vpop.permute.xlu1 %314 }
 0x7a1   :  { %v317_v47 = vmul.f32 %v315_v44, %v311_v43 }
 0x7a3   :  { %319 = vrot.lane.b32.xlu0 %v317_v47, %s791_s3  ;;  %v429_v47 = vld [vmem:[#allocation4 + $0x6] sm:$0x1] }
 0x815   :  { %v320_v49 = vpop.permute.xlu0 %319 }
 0x816   :  { %v322_v50 = vadd.f32 %v320_v49, %v312_v48 }
 0x818   :  { %733 = vtanh.f32 %v322_v50 }
 0x825   :  { %v734_v51 = vpop.eup %733 }
 0x826   :  { %325 = vrot.lane.b32.xlu1 %v734_v51, %s794_s27 }
 0x898   :  { %v326_v52 = vpop.permute.xlu1 %325 }
 0x899   :  { %v902_v53 = vmul.f32 %v326_v52, %v311_v43 }
 0x89b   :  { %344 = vperm.xlu1 %705, %v902_v53   ;;  %339 = vperm.xlu0 %704, %v902_v53  }
 0x89f   :  { %706 = vset.pattern.permute.xlu1 %v792_v41  ;;  %707 = vset.pattern.permute.xlu0 %v793_v42 }
 0x916   :  { %v345_v54 = vpop.permute.xlu1 %344  ;;  %v340_v55 = vpop.permute.xlu0 %339 }
 0x917   :  { %v347_v56 = vmul.f32 %v345_v54, %v869_v46  ;;  %v342_v57 = vmul.f32 %v340_v55, %v845_v11 }
 0x919   :  { %v348_v58 = vadd.f32 %v347_v56, %v342_v57 }
 0x91b   :  { %v349_v60 = vadd.f32 %v348_v58, %v337_v59 }
 0x91d   :  { %v667_v61 = vmul.f32 -1.442695, %v349_v60 }
 0x91f   :  { %735 = vpow2.f32 %v667_v61 }
 0x92c   :  { %v736_v62 = vpop.eup %735 }
 0x92d   :  { %v353_v63 = vadd.f32 1.0, %v736_v62 }
 0x92f   :  { %737 = vrcp.f32 %v353_v63 }
 0x93c   :  { %v738_v0 = vpop.eup %737 }
 0x93d   :  { %v356_v1 = vmul.f32 %v738_v0, %v852_v29 }
 0x93f   :  { %v357_v2 = vadd.f32 %v356_v1, %v854_v31 }
 0x941   :  { %360 = vrot.lane.b32.xlu0 %v357_v2, %s790_s2  ;;  %v358_v7 = vmul.f32 %v357_v2, %v322_v50 }
 0x9b3   :  { %v361_v4 = vpop.permute.xlu0 %360 }
 0x9b4   :  { %v363_v6 = vmul.f32 %v361_v4, %v357_v2  ;;  %v475_v4 = vld [vmem:[#allocation4 + $0x7] sm:$0x1] }
 0x9b6   :  { %365 = vrot.lane.b32.xlu1 %v363_v6, %s791_s3 }
 0xa28   :  { %v366_v8 = vpop.permute.xlu1 %365 }
 0xa29   :  { %v368_v9 = vadd.f32 %v366_v8, %v358_v7 }
 0xa2b   :  { %739 = vtanh.f32 %v368_v9 }
 0xa38   :  { %v740_v10 = vpop.eup %739 }
 0xa39   :  { %371 = vrot.lane.b32.xlu0 %v740_v10, %s794_s27 }
 0xaab   :  { %v372_v12 = vpop.permute.xlu0 %371 }
 0xaac   :  { %v915_v13 = vmul.f32 %v372_v12, %v357_v2 }
 0xaae   :  { %390 = vperm.xlu0 %707, %v915_v13   ;;  %385 = vperm.xlu1 %706, %v915_v13  }
 0xb29   :  { %v391_v14 = vpop.permute.xlu0 %390  ;;  %v386_v15 = vpop.permute.xlu1 %385 }
 0xb2a   :  { %v393_v16 = vmul.f32 %v391_v14, %v869_v46  ;;  %v388_v17 = vmul.f32 %v386_v15, %v845_v11 }
 0xb2c   :  { %v394_v18 = vadd.f32 %v393_v16, %v388_v17 }
 0xb2e   :  { %v395_v20 = vadd.f32 %v394_v18, %v383_v19  ;;  %v527_v19 = vld [vmem:[%s980_s5] sm:$0x7] }
 0xb30   :  { %v668_v21 = vmul.f32 -1.442695, %v395_v20 }
 0xb32   :  { %741 = vpow2.f32 %v668_v21 }
 0xb3f   :  { %v742_v22 = vpop.eup %741 }
 0xb40   :  { %v399_v23 = vadd.f32 1.0, %v742_v22 }
 0xb42   :  { %743 = vrcp.f32 %v399_v23 }
 0xb4f   :  { %v744_v24 = vpop.eup %743 }
 0xb50   :  { %v402_v25 = vmul.f32 %v744_v24, %v852_v29  ;;  %v525_v24 = vld [vmem:[%s979_s4] sm:$0x7]  ;;  %s797_s4 = smov [#allocation6]  }
 0xb51   :  { %s637_s9 = sshll.u32 %s797_s4, 4  ;;  %s638_s9 = int_to_ptr.vmem [resolvable:$true] %s637_s9 }
 0xb52   :  { %v403_v27 = vadd.f32 %v402_v25, %v854_v31  ;;  %s763_s10 = scalar_lea.vmem %s638_s9, 64  ;;  %p768_p1 = scmp.lt.s32.totalorder %s638_s9, %s638_s9 }
 0xb53   :  { %p764_p0 = scmp.ne.s32.totalorder %s638_s9, %s763_s10  ;;  %p769_p2 = scmp.lt.s32.totalorder %s763_s10, %s763_s10 }
 0xb54   :  { %406 = vrot.lane.b32.xlu1 %v403_v27, %s790_s2  ;;  %v404_v32 = vmul.f32 %v403_v27, %v368_v9 }
 0xb55   :  { %p770_p3 = por %p769_p2, %p768_p1 }
 0xb57   :  { %p771_p4 = pnand %p770_p3, %p764_p0 }
 0xbc6   :  { %v407_v28 = vpop.permute.xlu1 %406 }
 0xbc7   :  { %v409_v30 = vmul.f32 %v407_v28, %v403_v27 }
 0xbc9   :  { %411 = vrot.lane.b32.xlu1 %v409_v30, %s791_s3 }
 0xc3b   :  { %v412_v33 = vpop.permute.xlu1 %411 }
 0xc3c   :  { %v414_v34 = vadd.f32 %v412_v33, %v404_v32 }
 0xc3e   :  { %745 = vtanh.f32 %v414_v34 }
 0xc4b   :  { %v746_v35 = vpop.eup %745 }
 0xc4c   :  { %417 = vrot.lane.b32.xlu0 %v746_v35, %s794_s27 }
 0xcbe   :  { %v418_v36 = vpop.permute.xlu0 %417 }
 0xcbf   :  { %v926_v37 = vmul.f32 %v418_v36, %v403_v27 }
 0xcc1   :  { %436 = vperm.xlu0 %707, %v926_v37   ;;  %431 = vperm.xlu1 %706, %v926_v37  }
 0xcc5   :  { %708 = vset.pattern.permute.xlu0 %v792_v41  ;;  %709 = vset.pattern.permute.xlu1 %v793_v42 }
 0xd3c   :  { %v437_v38 = vpop.permute.xlu0 %436  ;;  %v432_v39 = vpop.permute.xlu1 %431 }
 0xd3d   :  { %v439_v40 = vmul.f32 %v437_v38, %v869_v46  ;;  %v434_v43 = vmul.f32 %v432_v39, %v845_v11 }
 0xd3f   :  { %v440_v44 = vadd.f32 %v439_v40, %v434_v43 }
 0xd41   :  { %v441_v48 = vadd.f32 %v440_v44, %v429_v47 }
 0xd43   :  { %v669_v49 = vmul.f32 -1.442695, %v441_v48 }
 0xd45   :  { %747 = vpow2.f32 %v669_v49 }
 0xd52   :  { %v748_v50 = vpop.eup %747 }
 0xd53   :  { %v445_v51 = vadd.f32 1.0, %v748_v50 }
 0xd55   :  { %749 = vrcp.f32 %v445_v51 }
 0xd62   :  { %v750_v52 = vpop.eup %749 }
 0xd63   :  { %v448_v54 = vmul.f32 %v750_v52, %v852_v29 }
 0xd65   :  { %v449_v41 = vadd.f32 %v448_v54, %v854_v31 }
 0xd67   :  { %452 = vrot.lane.b32.xlu1 %v449_v41, %s790_s2  ;;  %v450_v56 = vmul.f32 %v449_v41, %v414_v34 }
 0xdd9   :  { %v453_v42 = vpop.permute.xlu1 %452 }
 0xdda   :  { %v455_v55 = vmul.f32 %v453_v42, %v449_v41 }
 0xddc   :  { %457 = vrot.lane.b32.xlu0 %v455_v55, %s791_s3 }
 0xe4e   :  { %v458_v57 = vpop.permute.xlu0 %457 }
 0xe4f   :  { %v460_v58 = vadd.f32 %v458_v57, %v450_v56 }
 0xe51   :  { %751 = vtanh.f32 %v460_v58 }
 0xe5e   :  { %v752_v59 = vpop.eup %751 }
 0xe5f   :  { %463 = vrot.lane.b32.xlu1 %v752_v59, %s794_s27 }
 0xed1   :  { %v464_v60 = vpop.permute.xlu1 %463 }
 0xed2   :  { %v466_v61 = vmul.f32 %v464_v60, %v449_v41 }
 0xed4   :  { %482 = vperm.xlu1 %709, %v466_v61   ;;  %477 = vperm.xlu0 %708, %v466_v61  }
 0xed8   :  { %710 = vset.pattern.permute.xlu0 %v788_v5 }
 0xf4f   :  { %v483_v62 = vpop.permute.xlu1 %482  ;;  %v478_v63 = vpop.permute.xlu0 %477 }
 0xf50   :  { %v485_v0 = vmul.f32 %v483_v62, %v869_v46  ;;  %v480_v1 = vmul.f32 %v478_v63, %v845_v11 }
 0xf52   :  { %v486_v2 = vadd.f32 %v485_v0, %v480_v1 }
 0xf54   :  { %v487_v6 = vadd.f32 %v486_v2, %v475_v4 }
 0xf56   :  { %v670_v7 = vmul.f32 -1.442695, %v487_v6 }
 0xf58   :  { %753 = vpow2.f32 %v670_v7 }
 0xf65   :  { %v754_v8 = vpop.eup %753 }
 0xf66   :  { %v491_v9 = vadd.f32 1.0, %v754_v8 }
 0xf68   :  { %755 = vrcp.f32 %v491_v9 }
 0xf75   :  { %v756_v10 = vpop.eup %755 }
 0xf76   :  { %v494_v12 = vmul.f32 %v756_v10, %v852_v29 }
 0xf78   :  { %v495_v14 = vadd.f32 %v494_v12, %v854_v31 }
 0xf7a   :  { %498 = vrot.lane.b32.xlu1 %v495_v14, %s790_s2  ;;  %v496_v11 = vmul.f32 %v495_v14, %v460_v58 }
 0xfec   :  { %v499_v5 = vpop.permute.xlu1 %498 }
 0xfed   :  { %v501_v15 = vmul.f32 %v499_v5, %v495_v14 }
 0xfef   :  { %503 = vrot.lane.b32.xlu0 %v501_v15, %s791_s3 }
 0xff3   :  { %189 = vrot.lane.b32.xlu0 %v864_v45, %s795_s28 }
 0xff7   :  { %284 = vrot.lane.b32.xlu0 %v891_v26, %s795_s28 }
 0xffb   :  { %376 = vrot.lane.b32.xlu0 %v915_v13, %s795_s28 }
 0xfff   :  { %468 = vrot.lane.b32.xlu0 %v466_v61, %s795_s28 }
0x1003   :  { %530 = vperm.xlu0 %710, %v527_v19  }
0x1061   :  { %v504_v46 = vpop.permute.xlu0 %503 }
0x1062   :  { %v506_v16 = vadd.f32 %v504_v46, %v496_v11 }
0x1064   :  { %757 = vtanh.f32 %v506_v16 }
0x1065   :  { %v190_v29 = vpop.permute.xlu0 %189 }
0x1066   :  { %193 = vst.msk [vmem:[#allocation5] sm:$0x1] %vm28_vm0, %v190_v29 }
0x1069   :  { %v285_v31 = vpop.permute.xlu0 %284 }
0x106a   :  { %288 = vst.msk [vmem:[#allocation5 + $0x2] sm:$0x1] %vm28_vm0, %v285_v31 }
0x106d   :  { %v377_v17 = vpop.permute.xlu0 %376 }
0x106e   :  { %380 = vst.msk [vmem:[#allocation5 + $0x4] sm:$0x1] %vm28_vm0, %v377_v17 }
0x1071   :  { %v758_v18 = vpop.eup %757  ;;  %v469_v45 = vpop.permute.xlu0 %468 }
0x1072   :  { %472 = vst.msk [vmem:[#allocation5 + $0x6] sm:$0x1] %vm28_vm0, %v469_v45  ;;  %509 = vrot.lane.b32.xlu1 %v758_v18, %s794_s27 }
0x1076   :  { %238 = vrot.lane.b32.xlu1 %v878_v3, %s795_s28 }
0x107a   :  { %330 = vrot.lane.b32.xlu1 %v902_v53, %s795_s28 }
0x107e   :  { %422 = vrot.lane.b32.xlu1 %v926_v37, %s795_s28  ;;  %v531_v25 = vpop.permute.xlu0 %530 }
0x10e4   :  { %v510_v26 = vpop.permute.xlu1 %509 }
0x10e5   :  { %v512_v13 = vmul.f32 %v510_v26, %v495_v14 }
0x10e7   :  { %514 = vrot.lane.b32.xlu1 %v512_v13, %s795_s28 }
0x10e8   :  { %v239_v20 = vpop.permute.xlu1 %238 }
0x10e9   :  { %242 = vst.msk [vmem:[#allocation5 + $0x1] sm:$0x1] %vm28_vm0, %v239_v20 }
0x10eb   :  { %521 = vrot.lane.b32.xlu1 %v506_v16, %s796_s7 }
0x10ec   :  { %v331_v21 = vpop.permute.xlu1 %330 }
0x10ed   :  { %334 = vst.msk [vmem:[#allocation5 + $0x3] sm:$0x1] %vm28_vm0, %v331_v21 }
0x10f0   :  { %v423_v3 = vpop.permute.xlu1 %422 }
0x10f1   :  { %426 = vst.msk [vmem:[#allocation5 + $0x5] sm:$0x1] %vm28_vm0, %v423_v3 }
0x1159   :  { %v515_v53 = vpop.permute.xlu1 %514 }
0x115a   :  { %518 = vst.msk [vmem:[#allocation5 + $0x7] sm:$0x1] %vm28_vm0, %v515_v53  ;;  %519 = vst.msk [vmem:[#allocation2] sm:$0x1] %vm28_vm0, %v515_v53 }
0x115d   :  { %v522_v22 = vpop.permute.xlu1 %521 }
0x115e   :  { %524 = vst.msk [vmem:[#allocation3] sm:$0x1] %vm28_vm0, %v522_v22 }
0x1161   :  { %v526_v23 = vld [vmem:[#allocation5] sm:$0xff] }
0x1162   :  { %683 = vmatpush3.xpose.msk.msra.mxu1 %vm533_vm8, %v526_v23 }
0x1165   :  { %685 = vmatmul.mubr.msk.f32.vlgmr.msra.gmra.mxu1 %vm533_vm8, %v525_v24 }
0x1225   :  { %v606_v27 = vpop.f32.mrf.mxu1 }
0x1226   :  { %v607_v28 = vadd.f32 %v606_v27, %v531_v25 }
0x1227   :  { %v686_v30 = vpop.f32.mrf.mxu1 }
0x1228   :  { %v611_v32 = vsel %vm610_vm9, %v607_v28, -inf }
0x1229   :  { %v612_v33 = vrot.slane %v611_v32, 4 }
0x122b   :  { %v613_v34 = vmax.f32 %v611_v32, %v612_v33 }
0x122d   :  { %v614_v35 = vrot.slane %v613_v34, 2 }
0x122f   :  { %v615_v36 = vmax.f32 %v613_v34, %v614_v35 }
0x1231   :  { %v616_v37 = vrot.slane %v615_v36, 1 }
0x1233   :  { %v617_v38 = vmax.f32 %v615_v36, %v616_v37 }
0x1235   :  { %v618_v39 = vsub.f32 %v607_v28, %v617_v38 }
0x1237   :  { %v619_v40 = vmul.f32 1.442695, %v618_v39 }
0x1239   :  { %759 = vpow2.f32 %v619_v40 }
0x1246   :  { %v760_v43 = vpop.eup %759 }
0x1247   :  { %v621_v44 = vsel %vm610_vm9, %v760_v43, 0.0 }
0x1248   :  { %v622_v47 = vrot.slane %v621_v44, 4 }
0x124a   :  { %v623_v48 = vadd.f32 %v622_v47, %v621_v44 }
0x124c   :  { %v624_v49 = vrot.slane %v623_v48, 2 }
0x124e   :  { %v625_v50 = vadd.f32 %v624_v49, %v623_v48 }
0x1250   :  { %v626_v51 = vrot.slane %v625_v50, 1 }
0x1252   :  { %v627_v52 = vadd.f32 %v626_v51, %v625_v50 }
0x1254   :  { %761 = vrcp.f32 %v627_v52 }
0x1261   :  { %v762_v54 = vpop.eup %761 }
0x1262   :  { %v629_v41 = vmul.f32 %v762_v54, %v760_v43 }
0x1264   :  { %630 = vst.msk [vmem:[#allocation6] sm:$0x7] %vm610_vm9, %v629_v41 }
0x1265   :  { %774 = shalt.err (!%p771_p4)
}
0x1266   :  { %640 = dma.vmem_to_hbm [thread:$0]  %s638_s9, 64, %s981_s6, [#allocation7]  }
0x1267   :  { %783 = dma.done.wait [#allocation7], 64  }
0x1268   :  { %784 = vsyncadd [#allocation7], 4294967232 }
0x1269   :  { %644 = vsyncpa [#allocation7], 1 }

</bundles_post_ra>
